<compile_context>
chip_gen: v7x
topology: tpu7x:2x2x1
jax: 0.10.0
libtpu: 0.0.40
codegen_flags: <defaults>
</compile_context>

<pallas_src>
import math

import jax
import jax.numpy as jnp
from jax import lax
from jax.experimental import pallas as pl
from jax.experimental.pallas import tpu as pltpu


def _round_up(x: int, m: int) -> int:
    return ((x + m - 1) // m) * m


def f1_kernel(x_ref, w0_ref, b0_ref, w1_ref, b1_ref, o_ref):
    # In-kernel cast of the activation tile to the weights' compute dtype
    # (bf16 by default; no-op on the fp32 path).  Cheap VPU work, hidden
    # under the next x-tile DMA.
    x = x_ref[...].astype(w0_ref.dtype)

    # Layer 0: hidden = relu(x @ W0.T + b0).  Contract W0's last axis directly
    # (no transpose op anywhere); accumulate in f32 on the MXU.
    hidden = lax.dot_general(
        x, w0_ref[...],
        dimension_numbers=(((1,), (1,)), ((), ())),
        preferred_element_type=jnp.float32,
    )                                               # (bn, h) f32
    hidden = jnp.maximum(hidden + b0_ref[...], 0.0)  # bias + ReLU in f32 (VPU)

    # Layer 1: out = hidden @ W1.T + b1
    hidden = hidden.astype(w1_ref.dtype)             # match MXU input dtype
    out = lax.dot_general(
        hidden, w1_ref[...],
        dimension_numbers=(((1,), (1,)), ((), ())),
        preferred_element_type=jnp.float32,
    )                                               # (bn, k) f32
    o_ref[...] = (out + b1_ref[...]).astype(o_ref.dtype)


def f1_forward(x, W0, b0, W1, b1, *, block_n=None, compute_dtype=jnp.bfloat16):
    """Pallas implementation of F1.forward.

    x: (n, d) float32 -> (n, k) float32.

    compute_dtype:
      jnp.bfloat16 (default) — MXU fast path on v5e/v6e/v7x; weights cast in the
        wrapper (tiny), x cast in-kernel; f32 accumulation, bias and ReLU.
      None — exact fp32 everywhere (slower: fp32 matmul is emulated on the MXU).
    """
    n, d = x.shape
    h, _ = W0.shape
    k, _ = W1.shape

    # Batch tiling: ~2 balanced parallel steps (covers v7x's two TensorCores;
    # near-free on single-TC v5e/v6e), multiples of 16 for bf16 sublane packing.
    if block_n is None:
        block_n = min(512, _round_up(max(-(-n // 2), 16), 16))
    block_n = _round_up(min(block_n, _round_up(n, 16)), 16)
    n_pad = _round_up(n, block_n)
    grid = (n_pad // block_n,)

    # Only pad the batch dim, and only when ragged (padded rows are sliced off).
    xp = x if n_pad == n else jnp.pad(x, ((0, n_pad - n), (0, 0)))

    # Weights are tiny: cast them once in the wrapper.  Biases stay f32 (added
    # to the f32 MXU accumulator).
    if compute_dtype is not None:
        W0c = W0.astype(compute_dtype)
        W1c = W1.astype(compute_dtype)
    else:
        W0c, W1c = W0, W1
    b0r = b0.astype(jnp.float32).reshape(1, h)
    b1r = b1.astype(jnp.float32).reshape(1, k)

    out = pl.pallas_call(
        f1_kernel,
        out_shape=jax.ShapeDtypeStruct((n_pad, k), jnp.float32),
        grid_spec=pltpu.PrefetchScalarGridSpec(
            num_scalar_prefetch=0,
            grid=grid,
            in_specs=[
                # Non-batch block dims equal the full array dims -> no wrapper
                # padding needed; Mosaic handles internal (8,128) layout padding.
                pl.BlockSpec((block_n, d), lambda i: (i, 0)),   # x tile
                pl.BlockSpec((h, d), lambda i: (0, 0)),         # W0 (resident)
                pl.BlockSpec((1, h), lambda i: (0, 0)),         # b0
                pl.BlockSpec((k, h), lambda i: (0, 0)),         # W1 (resident)
                pl.BlockSpec((1, k), lambda i: (0, 0)),         # b1
            ],
            out_specs=pl.BlockSpec((block_n, k), lambda i: (i, 0)),
        ),
        compiler_params=pltpu.CompilerParams(
            # Batch tiles are independent -> shard across TensorCores on v7x.
            dimension_semantics=("parallel",),
            # NOTE: at these shapes VMEM use is far below the scoped default on
            # every generation; set vmem_limit_bytes explicitly if h/d/block_n
            # are scaled up (v7x has only 64 MiB physical VMEM).
        ),
    )(xp, W0c, b0r, W1c, b1r)

    return out if n_pad == n else out[:n]


def f1_reference(x, W0, b0, W1, b1):
    hidden = jnp.maximum(x @ W0.T + b0, 0.0)
    return hidden @ W1.T + b1


if __name__ == "__main__":
    # MNIST-flavored small shapes: n=512 samples, d=128 features, h=64 hidden,
    # k=10 classes.  block_n auto-picks 256 -> 2 parallel grid steps.
    n, d, h, k = 512, 128, 64, 10

    key = jax.random.PRNGKey(0)
    kx, k0, kb0, k1, kb1 = jax.random.split(key, 5)

    alpha = 1.0 / math.sqrt(d)
    x = jax.random.normal(kx, (n, d), dtype=jnp.float32)
    W0 = jax.random.uniform(k0, (h, d), jnp.float32, -alpha, alpha)
    b0 = jax.random.uniform(kb0, (h,), jnp.float32, -alpha, alpha)
    W1 = jax.random.uniform(k1, (k, h), jnp.float32, -alpha, alpha)
    b1 = jax.random.uniform(kb1, (k,), jnp.float32, -alpha, alpha)

    ref = f1_reference(x, W0, b0, W1, b1)

    # Exact fp32 path.
    out_f32 = f1_forward(x, W0, b0, W1, b1, compute_dtype=None)
    out_f32 = jax.block_until_ready(out_f32)
    assert out_f32.shape == (n, k)
    assert jnp.allclose(out_f32, ref, atol=1e-4, rtol=1e-5), "fp32 mismatch vs reference"

    # Default bf16 compute path (MXU fast path on all generations).
    out_bf16 = f1_forward(x, W0, b0, W1, b1)
    out_bf16 = jax.block_until_ready(out_bf16)
    assert out_bf16.shape == (n, k)
    assert jnp.allclose(out_bf16, ref, atol=5e-2, rtol=5e-2), "bf16 mismatch vs reference"

    # Ragged-batch case (n not a multiple of block_n) still correct after
    # removing the feature/lane padding.
    n_r = 200
    out_r = jax.block_until_ready(f1_forward(x[:n_r], W0, b0, W1, b1))
    assert out_r.shape == (n_r, k)
    assert jnp.allclose(out_r, ref[:n_r], atol=5e-2, rtol=5e-2), "ragged-batch mismatch"

    print("KERNEL_OK")
</pallas_src>

<mosaic_0001>
module attributes {stable_mosaic.version = 11 : i64} {
  func.func @f1_kernel(%arg0: i32, %arg1: memref<256x128xf32, #tpu.memory_space<vmem>>, %arg2: memref<64x128xf32, #tpu.memory_space<vmem>>, %arg3: memref<1x64xf32, #tpu.memory_space<vmem>>, %arg4: memref<10x64xf32, #tpu.memory_space<vmem>>, %arg5: memref<1x10xf32, #tpu.memory_space<vmem>>, %arg6: memref<256x10xf32, #tpu.memory_space<vmem>>) attributes {dimension_semantics = [#tpu.dimension_semantics<parallel>], iteration_bounds = array<i64: 2>, scalar_prefetch = 0 : i64, scratch_operands = 0 : i64, tpu.core_type = #tpu.core_type<tc>, window_params = [{transform_indices = @transform_0, window_bounds = array<i64: 256, 128>}, {pipeline_mode = #tpu.pipeline_mode<synchronous>, transform_indices = @transform_1, window_bounds = array<i64: 64, 128>}, {pipeline_mode = #tpu.pipeline_mode<synchronous>, transform_indices = @transform_2, window_bounds = array<i64: 1, 64>}, {pipeline_mode = #tpu.pipeline_mode<synchronous>, transform_indices = @transform_3, window_bounds = array<i64: 10, 64>}, {pipeline_mode = #tpu.pipeline_mode<synchronous>, transform_indices = @transform_4, window_bounds = array<i64: 1, 10>}, {transform_indices = @transform_5, window_bounds = array<i64: 256, 10>}]} {
    %c0 = arith.constant 0 : index
    %c0_0 = arith.constant 0 : index
    %0 = vector.load %arg1[%c0, %c0_0] : memref<256x128xf32, #tpu.memory_space<vmem>>, vector<256x128xf32>
    %c0_1 = arith.constant 0 : index
    %c0_2 = arith.constant 0 : index
    %1 = vector.load %arg2[%c0_1, %c0_2] : memref<64x128xf32, #tpu.memory_space<vmem>>, vector<64x128xf32>
    %cst = arith.constant dense<0.000000e+00> : vector<256x64xf32>
    %2 = tpu.matmul %0, %1, %cst {dimension_numbers = #tpu.dot_dimension_numbers<[1], [1], [0], [0], [0, 0, 1, 0], [], []>} : vector<256x128xf32>, vector<64x128xf32>, vector<256x64xf32> -> vector<256x64xf32>
    %c0_3 = arith.constant 0 : index
    %c0_4 = arith.constant 0 : index
    %3 = vector.load %arg3[%c0_3, %c0_4] : memref<1x64xf32, #tpu.memory_space<vmem>>, vector<1x64xf32>
    %4 = vector.broadcast %3 : vector<1x64xf32> to vector<256x64xf32>
    %5 = arith.addf %2, %4 : vector<256x64xf32>
    %cst_5 = arith.constant 0.000000e+00 : f32
    %6 = vector.broadcast %cst_5 : f32 to vector<256x64xf32>
    %7 = arith.maximumf %5, %6 : vector<256x64xf32>
    %c0_6 = arith.constant 0 : index
    %c0_7 = arith.constant 0 : index
    %8 = vector.load %arg4[%c0_6, %c0_7] : memref<10x64xf32, #tpu.memory_space<vmem>>, vector<10x64xf32>
    %cst_8 = arith.constant dense<0.000000e+00> : vector<256x10xf32>
    %9 = tpu.matmul %7, %8, %cst_8 {dimension_numbers = #tpu.dot_dimension_numbers<[1], [1], [0], [0], [0, 0, 1, 0], [], []>} : vector<256x64xf32>, vector<10x64xf32>, vector<256x10xf32> -> vector<256x10xf32>
    %c0_9 = arith.constant 0 : index
    %c0_10 = arith.constant 0 : index
    %10 = vector.load %arg5[%c0_9, %c0_10] : memref<1x10xf32, #tpu.memory_space<vmem>>, vector<1x10xf32>
    %11 = vector.broadcast %10 : vector<1x10xf32> to vector<256x10xf32>
    %12 = arith.addf %9, %11 : vector<256x10xf32>
    %c0_11 = arith.constant 0 : index
    %c0_12 = arith.constant 0 : index
    %13 = vector.load %arg6[%c0_11, %c0_12] : memref<256x10xf32, #tpu.memory_space<vmem>>, vector<256x10xf32>
    tpu.vector_store %arg6[%c0_11, %c0_12], %12 {strides = array<i32>} : memref<256x10xf32, #tpu.memory_space<vmem>>, vector<256x10xf32>,
    return
  }
  func.func @transform_0(%arg0: i32) -> (i32, i32) {
    %c0_i32 = arith.constant 0 : i32
    %c0_i32_0 = arith.constant 0 : i32
    return %arg0, %c0_i32 : i32, i32
  }
  func.func @transform_1(%arg0: i32) -> (i32, i32) {
    %c0_i32 = arith.constant 0 : i32
    %c0_i32_0 = arith.constant 0 : i32
    %c0_i32_1 = arith.constant 0 : i32
    return %c0_i32, %c0_i32_0 : i32, i32
  }
  func.func @transform_2(%arg0: i32) -> (i32, i32) {
    %c0_i32 = arith.constant 0 : i32
    %c0_i32_0 = arith.constant 0 : i32
    %c0_i32_1 = arith.constant 0 : i32
    return %c0_i32, %c0_i32_0 : i32, i32
  }
  func.func @transform_3(%arg0: i32) -> (i32, i32) {
    %c0_i32 = arith.constant 0 : i32
    %c0_i32_0 = arith.constant 0 : i32
    %c0_i32_1 = arith.constant 0 : i32
    return %c0_i32, %c0_i32_0 : i32, i32
  }
  func.func @transform_4(%arg0: i32) -> (i32, i32) {
    %c0_i32 = arith.constant 0 : i32
    %c0_i32_0 = arith.constant 0 : i32
    %c0_i32_1 = arith.constant 0 : i32
    return %c0_i32, %c0_i32_0 : i32, i32
  }
  func.func @transform_5(%arg0: i32) -> (i32, i32) {
    %c0_i32 = arith.constant 0 : i32
    %c0_i32_0 = arith.constant 0 : i32
    return %arg0, %c0_i32 : i32, i32
  }
}

</mosaic_0001>

<bundles_post_ra>
// kernel: tpu_custom_call.1
= control target key start
LH: loop header
LB: loop body
LE: loop exit
PB: predicated region body
PF: predicated region fallthrough
CT: control target
= control target key end

     0   :  { %10 = vsyncpa [#allocation3], 0  ;;  %s1920_s0 = inlined_call_operand.hbm [shape: f32[512,128], index: 0, kind: input, shape index: {}]   ;;  %s1921_s1 = inlined_call_operand.hbm [shape: f32[64,128], index: 1, kind: input, shape index: {}]   ;;  %s1922_s2 = inlined_call_operand.vmem [shape: f32[1,64], index: 2, kind: input, shape index: {}]   ;;  %s1923_s3 = inlined_call_operand.hbm [shape: f32[10,64], index: 3, kind: input, shape index: {}]   ;;  %s1924_s4 = inlined_call_operand.vmem [shape: f32[1,10], index: 4, kind: input, shape index: {}]   ;;  %s1925_s5 = inlined_call_operand.vmem [shape: f32[512,10], index: 5, kind: output, shape index: {}]  }
   0x1   :  { %12 = vsyncpa [#allocation3 + $0x1], 0 }
   0x2   :  { %13 = vsyncpa [#allocation5], 0  ;;  %s1525_s18 = smov 0   ;;  %s1527_s19 = smov 0  }
   0x3   :  { %s1529_s20 = smov 0   ;;  %s1531_s21 = smov 0  }
   0x4 LB: > { %s1036_s22 = sadd.s32 4294967295, %s1488_s21   ;;  %p39_p0 = scmp.ne.s32.totalorder %s1480_s19, %s1476_s18  ;;  %s1488_s21 = sphi %s1531_s21, %s1941_s21   ;;  %s1484_s20 = sphi %s1529_s20, %s1940_s20   ;;  %s1480_s19 = sphi %s1527_s19, %s1939_s19   ;;  %s1476_s18 = sphi %s1525_s18, %s1938_s18  }
   0x5   : > { %p1547_p1 = scmp.eq.s32.totalorder %s1036_s22, 0  ;;  %p1038_p2 = scmp.ge.s32.totalorder %s1488_s21, 1 }
   0x6   : > { %p160_p3 = scmp.lt.s32.totalorder %s1488_s21, 3  ;;  %s1490_s26 = smov [#allocation4]  }
   0x7   : > { %s1930_s23 = scalar_select %p1547_p1, 1, 0 }
   0x8   : > { %p1555_p4 = por %p1547_p1, %p39_p0  ;;  %p1559_p5 = pnand %p1038_p2, %p160_p3 }
   0x9   : > { %s172_s27 = sshll.u32 %s1490_s26, 4  ;;  %s1491_s29 = smov [#allocation6]   ;;  %s173_s27 = int_to_ptr.vmem [resolvable:$true] %s172_s27 }
   0xa   : > { %s1931_s24 = scalar_select %p1555_p4, 1, 0 }
   0xb   : > { %s1932_s25 = scalar_select %p1559_p5, 1, 0 }
   0xc   : > { %p1312_p6 = pneg %p1559_p5  ;;  %s188_s30 = sshll.u32 %s1491_s29, 4  ;;  %s1571_s30 = int_to_ptr.vmem [resolvable:$true] %s188_s30 }
   0xd   : > { %s1364_s8 = scalar_lea.hbm %s1921_s1, 1024 }
   0xe   : > { %p1567_p7 = pnand %p1312_p6, %p1547_p1  ;;  %p1365_p8 = scmp.ne.s32.totalorder %s1921_s1, %s1364_s8 }
   0xf   : > { %p1371_p12 = scmp.lt.u32.totalorder %s1364_s8, %s1921_s1 }
  0x10   : > { %p1366_p9 = pneg %p1567_p7 }
  0x12   : > { %p1367_p10 = pnand %p1366_p9, %p1365_p8 }
  0x14   : > { %p1368_p11 = pneg %p1367_p10 }
  0x16   : > { %p1373_p13 = pnand %p1371_p12, %p1368_p11 }
  0x18   : > { %1376 = shalt.err (!%p1373_p13)
}
  0x19   : > { %s1377_s13 = scalar_lea.vmem %s173_s27, 1024  ;;  %p1385_p6 = scmp.lt.s32.totalorder %s173_s27, %s173_s27 }
  0x1a   : > { %p1378_p0 = scmp.ne.s32.totalorder %s173_s27, %s1377_s13  ;;  %p1386_p1 = scmp.lt.s32.totalorder %s1377_s13, %s1377_s13 }
  0x1c   : > { %p1380_p2 = pnand %p1378_p0, %p1366_p9  ;;  %p1387_p4 = por %p1386_p1, %p1385_p6 }
  0x1e   : > { %p1381_p3 = pneg %p1380_p2 }
  0x20   : > { %p1388_p5 = pnand %p1387_p4, %p1381_p3 }
  0x22   : > { %1391 = shalt.err (!%p1388_p5)
}
  0x23   : > { %s1492_s14 = smov 128   ;;  %s1493_s15 = smov 8  }
  0x24   : > { %1315 = dma.hbm_to_vmem [thread:$0]  (!%p1567_p7), %s1921_s1, 1024, %s173_s27, [#allocation5], %s1492_s14, %s1492_s14, %s1493_s15  }
  0x25   : > { %s1392_s29 = scalar_lea.hbm %s1923_s3, 256 }
  0x26   : > { %p1393_p1 = scmp.ne.s32.totalorder %s1923_s3, %s1392_s29  ;;  %p1399_p8 = scmp.lt.u32.totalorder %s1392_s29, %s1923_s3 }
  0x28   : > { %p1395_p4 = pnand %p1393_p1, %p1366_p9 }
  0x2a   : > { %p1396_p5 = pneg %p1395_p4 }
  0x2c   : > { %p1401_p10 = pnand %p1399_p8, %p1396_p5 }
  0x2e   : > { %1404 = shalt.err (!%p1401_p10)
}
  0x2f   : > { %s1405_s27 = scalar_lea.vmem %s1571_s30, 256  ;;  %p1413_p0 = scmp.lt.s32.totalorder %s1571_s30, %s1571_s30 }
  0x30   : > { %p1406_p11 = scmp.ne.s32.totalorder %s1571_s30, %s1405_s27  ;;  %p1414_p2 = scmp.lt.s32.totalorder %s1405_s27, %s1405_s27 }
  0x32   : > { %p1408_p12 = pnand %p1406_p11, %p1366_p9  ;;  %p1415_p3 = por %p1414_p2, %p1413_p0 }
  0x34   : > { %p1409_p13 = pneg %p1408_p12 }
  0x36   : > { %p1416_p6 = pnand %p1415_p3, %p1409_p13 }
  0x38   : > { %1419 = shalt.err (!%p1416_p6)
}
  0x39   : > { %1318 = dma.hbm_to_vmem [thread:$0]  (!%p1567_p7), %s1923_s3, 256, %s1571_s30, [#allocation5], %s1492_s14, %s1492_s14, %s1493_s15  }
  0x3a   : > { %s1627_s12 = sadd.s32 1, %s1488_s21   ;;  %s26_s28 = sadd.s32 1, %s1484_s20 }
  0x3b   : > { %s23_s13 = ssub.s32 %s1488_s21, %s1627_s12  ;;  %p33_p9 = scmp.ne.s32.totalorder %s1484_s20, %s1480_s19 }
  0x3c   : > { %p24_p1 = scmp.eq.s32.totalorder %s23_s13, 0  ;;  %p34_p4 = scmp.eq.s32.totalorder %s1488_s21, 0 }
  0x3d   : > { %p1325_p5 = scmp.lt.s32.totalorder %s1488_s21, 2  ;;  %s205_s16 = sand.u32 1, %s1484_s20  }
  0x3e   : > { %s1638_s17 = scalar_select %p24_p1, %s1484_s20, %s26_s28  }
  0x3f   : > { %p35_p8 = por %p34_p4, %p33_p9  ;;  %s1042_s18 = sshll.u32 %s205_s16, 8 }
  0x40   : > { %s1089_s26 = sshll.u32 %s1488_s21, 12  ;;  %s209_s30 = scalar_lea.vmem [#allocation2], %s1042_s18 }
  0x41   : > { %s1644_s7 = scalar_lea.hbm %s1920_s0, %s1089_s26  ;;  %s216_s8 = sshll.u32 %s209_s30, 4  ;;  %s1650_s8 = int_to_ptr.vmem [resolvable:$true] %s216_s8 }
  0x42   : > { %p1646_p7 = pnand %p1325_p5, %p35_p8  ;;  %s1652_s27 = scalar_lea.sflag [#allocation3], %s205_s16 }
  0x43   : > { %s1420_s10 = scalar_lea.hbm %s1644_s7, 4096  ;;  %s1425_s13 = scalar_lea.hbm %s1920_s0, 8192 }
  0x44   : > { %p1421_p10 = scmp.ne.s32.totalorder %s1644_s7, %s1420_s10  ;;  %p1422_p11 = pneg %p1646_p7 }
  0x45   : > { %p1426_p0 = scmp.lt.u32.totalorder %s1644_s7, %s1920_s0  ;;  %p1427_p2 = scmp.lt.u32.totalorder %s1425_s13, %s1420_s10 }
  0x46   : > { %p1423_p12 = pnand %p1422_p11, %p1421_p10  ;;  %p1429_p6 = scmp.lt.u32.totalorder %s1420_s10, %s1644_s7 }
  0x47   : > { %p1428_p3 = por %p1427_p2, %p1426_p0 }
  0x48   : > { %p1424_p13 = pneg %p1423_p12 }
  0x49   : > { %p1430_p9 = por %p1429_p6, %p1428_p3 }
  0x4b   : > { %p1431_p1 = pnand %p1430_p9, %p1424_p13 }
  0x4d   : > { %1434 = shalt.err (!%p1431_p1)
}
  0x4e   : > { %s1435_s16 = scalar_lea.vmem %s1650_s8, 4096  ;;  %s1494_s29 = smov [#allocation2]  }
  0x4f   : > { %p1436_p4 = scmp.ne.s32.totalorder %s1650_s8, %s1435_s16  ;;  %s1440_s6 = sshll.u32 %s1494_s29, 4  ;;  %s1441_s6 = int_to_ptr.vmem [resolvable:$false] %s1440_s6 }
  0x50   : > { %s1442_s30 = scalar_lea.vmem %s1441_s6, 8192  ;;  %p1443_p10 = scmp.lt.s32.totalorder %s1650_s8, %s1441_s6 }
  0x51   : > { %p1438_p5 = pnand %p1436_p4, %p1422_p11  ;;  %p1444_p12 = scmp.lt.s32.totalorder %s1442_s30, %s1435_s16 }
  0x53   : > { %p1439_p8 = pneg %p1438_p5  ;;  %p1445_p0 = por %p1444_p12, %p1443_p10 }
  0x55   : > { %p1446_p2 = pnand %p1445_p0, %p1439_p8 }
  0x57   : > { %1449 = shalt.err (!%p1446_p2)
}
  0x58   : > { %1322 = dma.hbm_to_vmem [thread:$0]  (!%p1646_p7), %s1644_s7, 4096, %s1650_s8, %s1652_s27, %s1492_s14, %s1492_s14, %s1493_s15  }
  0x59   : > { %p1935_p11 = scmp.ne.s32.totalorder %s1932_s25, 0 }
  0x5a   : > { %s230_s10 = sand.u32 (!%p1935_p11), 1, %s1480_s19   ;;  %p1936_p13 = scmp.ne.s32.totalorder (!%p1935_p11), %s1931_s24, 0 }
  0x5b   : > { %228 = sbr.rel (%p1935_p11) target bundleno = 631 (0x277), region = 40  ;;  %s1046_s11 = sshll.u32 (!%p1935_p11), %s230_s10, 8 }
  0x5c   : > { %s231_s28 = scalar_lea.sflag (!%p1935_p11), [#allocation3], %s230_s10  ;;  %s1686_s13 = scalar_lea.vmem (!%p1935_p11), [#allocation2], %s1046_s11 }
  0x62   : > { %1467 = dma.done.wait (%p1936_p13), %s231_s28, 4096  }
  0x63   : > { %1469 = vsyncadd (%p1936_p13), %s231_s28, 4294963200  ;;  %p1937_p3 = scmp.ne.s32.totalorder %s1930_s23, 0 }
  0x65   : > { %1471 = dma.done.wait (%p1937_p3), [#allocation5], 1280  }
  0x66   : > { %1473 = vsyncadd (%p1937_p3), [#allocation5], 4294966016  ;;  %v308_v0 = vld [vmem:[#allocation4] sm:$0xff]  ;;  %v309_v1 = vld [vmem:[#allocation4 + $0x8] sm:$0xff]  ;;  %vm589_vm0 = vcmask 523264   ;;  %s1049_s25 = sshll.u32 %s1036_s22, 5 }
  0x67   : > { %v310_v2 = vld [vmem:[#allocation4 + $0x10] sm:$0xff]  ;;  %v1280_v3 = vpack.c.bf16 %v309_v1, %v308_v0  ;;  %v311_v4 = vld [vmem:[#allocation4 + $0x18] sm:$0xff]  ;;  %v276_v6 = vld [vmem:[%s1686_s13] sm:$0xff]  ;;  %p271_p7 = scmp.lt.s32.totalorder %s1049_s25, 63  ;;  %vm917_vm2 = vcmask 80896  }
  0x68   : > { %v1284_v5 = vpack.c.bf16 %v311_v4, %v310_v2  ;;  %1180 = vmatprep.mubr.f32.mxu0 %v276_v6  ;;  %v312_v7 = vld [vmem:[#allocation4 + $0x20] sm:$0xff]  ;;  %v313_v8 = vld [vmem:[#allocation4 + $0x28] sm:$0xff]  ;;  %vm1297_vm1 = vmpackc.low %vm589_vm0, %vm589_vm0 }
  0x69   : > { %1281 = vmatprep.subr.bf16.mxu0 %v1280_v3  ;;  %v1288_v9 = vpack.c.bf16 %v313_v8, %v312_v7  ;;  %v580_v10 = vld [vmem:[#allocation6] sm:$0xff]  ;;  %v581_v11 = vld [vmem:[#allocation6 + $0x8] sm:$0x3]  ;;  %v314_v12 = vld [vmem:[#allocation4 + $0x30] sm:$0xff]  ;;  %s1943_s25 = smov (!%p271_p7, %s1049_s25), 63 }
  0x6a   : > { %1283 = vmatpush3.bf16.xpose.msra.mxu0 %v1280_v3  ;;  %v315_v13 = vld [vmem:[#allocation4 + $0x38] sm:$0xff]  ;;  %v1296_v14 = vpack.c.bf16 %v581_v11, %v580_v10  ;;  %v277_v16 = vld [vmem:[%s1686_s13 + $0x8] sm:$0xff]  ;;  %v278_v17 = vld [vmem:[%s1686_s13 + $0x10] sm:$0xff]  ;;  %s1050_s14 = sshll.u32 %s1943_s25, 3 }
  0x6b   : > { %1285 = vmatprep.subr.bf16.mxu0 %v1284_v5  ;;  %v1292_v15 = vpack.c.bf16 %v315_v13, %v314_v12  ;;  %v279_v18 = vld [vmem:[%s1686_s13 + $0x18] sm:$0xff]  ;;  %v280_v19 = vld [vmem:[%s1686_s13 + $0x20] sm:$0xff]  ;;  %v281_v20 = vld [vmem:[%s1686_s13 + $0x28] sm:$0xff]  ;;  %s1809_s27 = scalar_lea.vmem %s1925_s5, %s1050_s14 }
  0x6c   : > { %1298 = vmatprep.subr.msk.bf16.mxu1 %vm1297_vm1, %v1296_v14  ;;  %v282_v21 = vld [vmem:[%s1686_s13 + $0x30] sm:$0xff]  ;;  %v283_v22 = vld [vmem:[%s1686_s13 + $0x38] sm:$0xff]  ;;  %v284_v23 = vld [vmem:[%s1686_s13 + $0x40] sm:$0xff] }
  0x6d   : > { %1301 = vmatpush3.bf16.xpose.msk.msra.mxu1 %vm1297_vm1, %v1296_v14  ;;  %v285_v24 = vld [vmem:[%s1686_s13 + $0x48] sm:$0xff]  ;;  %v286_v25 = vld [vmem:[%s1686_s13 + $0x50] sm:$0xff]  ;;  %v287_v26 = vld [vmem:[%s1686_s13 + $0x58] sm:$0xff] }
  0x6e   : > { %v288_v27 = vld [vmem:[%s1686_s13 + $0x60] sm:$0xff]  ;;  %v289_v28 = vld [vmem:[%s1686_s13 + $0x68] sm:$0xff]  ;;  %v290_v29 = vld [vmem:[%s1686_s13 + $0x70] sm:$0xff] }
  0x6f   : > { %v291_v30 = vld [vmem:[%s1686_s13 + $0x78] sm:$0xff]  ;;  %v292_v31 = vld [vmem:[%s1686_s13 + $0x80] sm:$0xff]  ;;  %v293_v32 = vld [vmem:[%s1686_s13 + $0x88] sm:$0xff] }
  0x70   : > { %v294_v33 = vld [vmem:[%s1686_s13 + $0x90] sm:$0xff]  ;;  %v295_v34 = vld [vmem:[%s1686_s13 + $0x98] sm:$0xff]  ;;  %v296_v35 = vld [vmem:[%s1686_s13 + $0xa0] sm:$0xff] }
  0x71   : > { %v297_v36 = vld [vmem:[%s1686_s13 + $0xa8] sm:$0xff]  ;;  %v298_v37 = vld [vmem:[%s1686_s13 + $0xb0] sm:$0xff]  ;;  %v299_v38 = vld [vmem:[%s1686_s13 + $0xb8] sm:$0xff] }
  0x72   : > { %1287 = vmatpush3.bf16.xpose.msra.mxu0 %v1284_v5  ;;  %v300_v39 = vld [vmem:[%s1686_s13 + $0xc0] sm:$0xff]  ;;  %v301_v40 = vld [vmem:[%s1686_s13 + $0xc8] sm:$0xff]  ;;  %v302_v41 = vld [vmem:[%s1686_s13 + $0xd0] sm:$0xff] }
  0x73   : > { %1289 = vmatprep.subr.bf16.mxu0 %v1288_v9  ;;  %v303_v42 = vld [vmem:[%s1686_s13 + $0xd8] sm:$0xff]  ;;  %v304_v43 = vld [vmem:[%s1686_s13 + $0xe0] sm:$0xff]  ;;  %v305_v44 = vld [vmem:[%s1686_s13 + $0xe8] sm:$0xff] }
  0x74   : > { %v306_v45 = vld [vmem:[%s1686_s13 + $0xf0] sm:$0xff]  ;;  %v307_v46 = vld [vmem:[%s1686_s13 + $0xf8] sm:$0xff]  ;;  %v1733_v47 = vld [vmem:[%s1922_s2] ss:$0 sm:$0xff] }
  0x7a   : > { %1291 = vmatpush3.bf16.xpose.msra.mxu0 %v1288_v9 }
  0x7b   : > { %1293 = vmatprep.subr.bf16.mxu0 %v1292_v15 }
  0x82   : > { %1295 = vmatpush3.bf16.xpose.msra.mxu0 %v1292_v15 }
  0x89   : > { %1181 = vmatmul.mubr.f32.vlgmr.msra.gmra.mrb[0].mxu0 %v277_v16 }
  0x8a   : > { %1183 = vmatprep.mubr.f32.mxu0 %v278_v17 }
  0x8d   : > { %1184 = vmatmul.mubr.f32.gmra.mrb[2].mxu0 %v279_v18 }
  0x8e   : > { %1186 = vmatprep.mubr.f32.mxu0 %v280_v19 }
  0x91   : > { %1187 = vmatmul.mubr.f32.gmra.mrb[4].mxu0 %v281_v20 }
  0x92   : > { %1189 = vmatprep.mubr.f32.mxu0 %v282_v21 }
  0x95   : > { %1190 = vmatmul.mubr.f32.gmra.mrb[6].mxu0 %v283_v22 }
  0x96   : > { %1192 = vmatprep.mubr.f32.mxu0 %v284_v23 }
  0x99   : > { %1193 = vmatmul.mubr.f32.gmra.mrb[8].mxu0 %v285_v24 }
  0x9a   : > { %1195 = vmatprep.mubr.f32.mxu0 %v286_v25 }
  0x9d   : > { %1196 = vmatmul.mubr.f32.gmra.mrb[10].mxu0 %v287_v26 }
  0x9e   : > { %1198 = vmatprep.mubr.f32.mxu0 %v288_v27 }
  0xa1   : > { %1199 = vmatmul.mubr.f32.gmra.mrb[12].mxu0 %v289_v28 }
  0xa2   : > { %1201 = vmatprep.mubr.f32.mxu0 %v290_v29 }
  0xa5   : > { %1202 = vmatmul.mubr.f32.gmra.mrb[14].mxu0 %v291_v30 }
  0xa6   : > { %1204 = vmatprep.mubr.f32.mxu0 %v292_v31 }
  0xa9   : > { %1205 = vmatmul.mubr.f32.gmra.mrb[16].mxu0 %v293_v32 }
  0xaa   : > { %1207 = vmatprep.mubr.f32.mxu0 %v294_v33 }
  0xad   : > { %1208 = vmatmul.mubr.f32.gmra.mrb[18].mxu0 %v295_v34 }
  0xae   : > { %1210 = vmatprep.mubr.f32.mxu0 %v296_v35 }
  0xb1   : > { %1211 = vmatmul.mubr.f32.gmra.mrb[20].mxu0 %v297_v36 }
  0xb2   : > { %1213 = vmatprep.mubr.f32.mxu0 %v298_v37 }
  0xb5   : > { %1214 = vmatmul.mubr.f32.gmra.mrb[22].mxu0 %v299_v38 }
  0xb6   : > { %1216 = vmatprep.mubr.f32.mxu0 %v300_v39 }
  0xb9   : > { %1217 = vmatmul.mubr.f32.gmra.mrb[24].mxu0 %v301_v40 }
  0xba   : > { %1219 = vmatprep.mubr.f32.mxu0 %v302_v41 }
  0xbd   : > { %1220 = vmatmul.mubr.f32.gmra.mrb[26].mxu0 %v303_v42 }
  0xbe   : > { %1222 = vmatprep.mubr.f32.mxu0 %v304_v43 }
  0xc1   : > { %1223 = vmatmul.mubr.f32.gmra.mrb[28].mxu0 %v305_v44 }
  0xc2   : > { %1225 = vmatprep.mubr.f32.mxu0 %v306_v45 }
  0xc5   : > { %1226 = vmatmul.mubr.f32.gmra.mrb[30].mxu0 %v307_v46 }
 0x15c   : > { %v1182_v48 = vpop.f32.mrb[0].mxu0 }
 0x15d   : > { %v395_v49 = vadd.f32 %v1182_v48, %v1733_v47  ;;  %v389_v50 = vpop.f32.mrb[1].mxu0 }
 0x15e   : > { %v390_v51 = vadd.f32 %v1733_v47, %v389_v50 }
 0x15f   : > { %v549_v54 = vmax.f32 %v395_v49, 0.0 }
 0x160   : > { %v548_v52 = vmax.f32 %v390_v51, 0.0  ;;  %v1185_v53 = vpop.f32.mrb[2].mxu0 }
 0x161   : > { %v405_v55 = vadd.f32 %v1185_v53, %v1733_v47  ;;  %v399_v56 = vpop.f32.mrb[3].mxu0 }
 0x162   : > { %v400_v57 = vadd.f32 %v1733_v47, %v399_v56  ;;  %1232 = vmatprep.mubr.msk.f32.mxu1 %vm589_vm0, %v548_v52 }
 0x163   : > { %1233 = vmatmul.mubr.msk.f32.vlgmr.msra.gmra.mrb[0].mxu1 %vm589_vm0, %v549_v54  ;;  %v551_v60 = vmax.f32 %v405_v55, 0.0 }
 0x164   : > { %v550_v58 = vmax.f32 %v400_v57, 0.0  ;;  %v1188_v59 = vpop.f32.mrb[4].mxu0 }
 0x165   : > { %v415_v61 = vadd.f32 %v1188_v59, %v1733_v47  ;;  %v409_v62 = vpop.f32.mrb[5].mxu0 }
 0x166   : > { %v410_v63 = vadd.f32 %v1733_v47, %v409_v62  ;;  %1235 = vmatprep.mubr.msk.f32.mxu1 %vm589_vm0, %v550_v58 }
 0x167   : > { %1236 = vmatmul.mubr.msk.f32.gmra.mrb[2].mxu1 %vm589_vm0, %v551_v60  ;;  %v553_v2 = vmax.f32 %v415_v61, 0.0 }
 0x168   : > { %v552_v0 = vmax.f32 %v410_v63, 0.0  ;;  %v1191_v1 = vpop.f32.mrb[6].mxu0 }
 0x169   : > { %v425_v3 = vadd.f32 %v1191_v1, %v1733_v47  ;;  %v419_v4 = vpop.f32.mrb[7].mxu0 }
 0x16a   : > { %v420_v5 = vadd.f32 %v1733_v47, %v419_v4  ;;  %1238 = vmatprep.mubr.msk.f32.mxu1 %vm589_vm0, %v552_v0 }
 0x16b   : > { %1239 = vmatmul.mubr.msk.f32.gmra.mrb[4].mxu1 %vm589_vm0, %v553_v2  ;;  %v555_v8 = vmax.f32 %v425_v3, 0.0 }
 0x16c   : > { %v554_v6 = vmax.f32 %v420_v5, 0.0  ;;  %v1194_v7 = vpop.f32.mrb[8].mxu0 }
 0x16d   : > { %v435_v9 = vadd.f32 %v1194_v7, %v1733_v47  ;;  %v429_v10 = vpop.f32.mrb[9].mxu0 }
 0x16e   : > { %v430_v11 = vadd.f32 %v1733_v47, %v429_v10  ;;  %1241 = vmatprep.mubr.msk.f32.mxu1 %vm589_vm0, %v554_v6 }
 0x16f   : > { %1242 = vmatmul.mubr.msk.f32.gmra.mrb[6].mxu1 %vm589_vm0, %v555_v8  ;;  %v557_v14 = vmax.f32 %v435_v9, 0.0 }
 0x170   : > { %v556_v12 = vmax.f32 %v430_v11, 0.0  ;;  %v1197_v13 = vpop.f32.mrb[10].mxu0 }
 0x171   : > { %v445_v15 = vadd.f32 %v1197_v13, %v1733_v47  ;;  %v439_v16 = vpop.f32.mrb[11].mxu0 }
 0x172   : > { %v440_v17 = vadd.f32 %v1733_v47, %v439_v16  ;;  %1244 = vmatprep.mubr.msk.f32.mxu1 %vm589_vm0, %v556_v12 }
 0x173   : > { %1245 = vmatmul.mubr.msk.f32.gmra.mrb[8].mxu1 %vm589_vm0, %v557_v14  ;;  %v559_v20 = vmax.f32 %v445_v15, 0.0 }
 0x174   : > { %v558_v18 = vmax.f32 %v440_v17, 0.0  ;;  %v1200_v19 = vpop.f32.mrb[12].mxu0  ;;  %v1804_v17 = vld [vmem:[%s1924_s4] ss:$0 sm:$0xff] }
 0x175   : > { %v455_v21 = vadd.f32 %v1200_v19, %v1733_v47  ;;  %v449_v22 = vpop.f32.mrb[13].mxu0 }
 0x176   : > { %v450_v23 = vadd.f32 %v1733_v47, %v449_v22  ;;  %1247 = vmatprep.mubr.msk.f32.mxu1 %vm589_vm0, %v558_v18 }
 0x177   : > { %1248 = vmatmul.mubr.msk.f32.gmra.mrb[10].mxu1 %vm589_vm0, %v559_v20  ;;  %v561_v26 = vmax.f32 %v455_v21, 0.0 }
 0x178   : > { %v560_v24 = vmax.f32 %v450_v23, 0.0  ;;  %v1203_v25 = vpop.f32.mrb[14].mxu0 }
 0x179   : > { %v465_v27 = vadd.f32 %v1203_v25, %v1733_v47  ;;  %v459_v28 = vpop.f32.mrb[15].mxu0 }
 0x17a   : > { %v460_v29 = vadd.f32 %v1733_v47, %v459_v28  ;;  %1250 = vmatprep.mubr.msk.f32.mxu1 %vm589_vm0, %v560_v24 }
 0x17b   : > { %1251 = vmatmul.mubr.msk.f32.gmra.mrb[12].mxu1 %vm589_vm0, %v561_v26  ;;  %v563_v32 = vmax.f32 %v465_v27, 0.0 }
 0x17c   : > { %v562_v30 = vmax.f32 %v460_v29, 0.0  ;;  %v1206_v31 = vpop.f32.mrb[16].mxu0 }
 0x17d   : > { %v475_v33 = vadd.f32 %v1206_v31, %v1733_v47  ;;  %v469_v34 = vpop.f32.mrb[17].mxu0 }
 0x17e   : > { %v470_v35 = vadd.f32 %v1733_v47, %v469_v34  ;;  %1253 = vmatprep.mubr.msk.f32.mxu1 %vm589_vm0, %v562_v30 }
 0x17f   : > { %1254 = vmatmul.mubr.msk.f32.gmra.mrb[14].mxu1 %vm589_vm0, %v563_v32  ;;  %v565_v38 = vmax.f32 %v475_v33, 0.0 }
 0x180   : > { %v564_v36 = vmax.f32 %v470_v35, 0.0  ;;  %v1209_v37 = vpop.f32.mrb[18].mxu0 }
 0x181   : > { %v485_v39 = vadd.f32 %v1209_v37, %v1733_v47  ;;  %v479_v40 = vpop.f32.mrb[19].mxu0 }
 0x182   : > { %v480_v41 = vadd.f32 %v1733_v47, %v479_v40  ;;  %1256 = vmatprep.mubr.msk.f32.mxu1 %vm589_vm0, %v564_v36 }
 0x183   : > { %1257 = vmatmul.mubr.msk.f32.gmra.mrb[16].mxu1 %vm589_vm0, %v565_v38  ;;  %v567_v44 = vmax.f32 %v485_v39, 0.0 }
 0x184   : > { %v566_v42 = vmax.f32 %v480_v41, 0.0  ;;  %v1212_v43 = vpop.f32.mrb[20].mxu0 }
 0x185   : > { %v495_v45 = vadd.f32 %v1212_v43, %v1733_v47  ;;  %v489_v46 = vpop.f32.mrb[21].mxu0 }
 0x186   : > { %v490_v48 = vadd.f32 %v1733_v47, %v489_v46  ;;  %1259 = vmatprep.mubr.msk.f32.mxu1 %vm589_vm0, %v566_v42 }
 0x187   : > { %1260 = vmatmul.mubr.msk.f32.gmra.mrb[18].mxu1 %vm589_vm0, %v567_v44  ;;  %v569_v51 = vmax.f32 %v495_v45, 0.0 }
 0x188   : > { %v568_v49 = vmax.f32 %v490_v48, 0.0  ;;  %v1215_v50 = vpop.f32.mrb[22].mxu0 }
 0x189   : > { %v505_v52 = vadd.f32 %v1215_v50, %v1733_v47  ;;  %v499_v53 = vpop.f32.mrb[23].mxu0 }
 0x18a   : > { %v500_v54 = vadd.f32 %v1733_v47, %v499_v53  ;;  %1262 = vmatprep.mubr.msk.f32.mxu1 %vm589_vm0, %v568_v49 }
 0x18b   : > { %1263 = vmatmul.mubr.msk.f32.gmra.mrb[20].mxu1 %vm589_vm0, %v569_v51  ;;  %v571_v57 = vmax.f32 %v505_v52, 0.0 }
 0x18c   : > { %v570_v55 = vmax.f32 %v500_v54, 0.0  ;;  %v1218_v56 = vpop.f32.mrb[24].mxu0 }
 0x18d   : > { %v515_v58 = vadd.f32 %v1218_v56, %v1733_v47  ;;  %v509_v59 = vpop.f32.mrb[25].mxu0 }
 0x18e   : > { %v510_v60 = vadd.f32 %v1733_v47, %v509_v59  ;;  %1265 = vmatprep.mubr.msk.f32.mxu1 %vm589_vm0, %v570_v55 }
 0x18f   : > { %1266 = vmatmul.mubr.msk.f32.gmra.mrb[22].mxu1 %vm589_vm0, %v571_v57  ;;  %v573_v63 = vmax.f32 %v515_v58, 0.0 }
 0x190   : > { %v572_v61 = vmax.f32 %v510_v60, 0.0  ;;  %v1221_v62 = vpop.f32.mrb[26].mxu0 }
 0x191   : > { %v525_v0 = vadd.f32 %v1221_v62, %v1733_v47  ;;  %v519_v1 = vpop.f32.mrb[27].mxu0 }
 0x192   : > { %v520_v2 = vadd.f32 %v1733_v47, %v519_v1  ;;  %1268 = vmatprep.mubr.msk.f32.mxu1 %vm589_vm0, %v572_v61 }
 0x193   : > { %1269 = vmatmul.mubr.msk.f32.gmra.mrb[24].mxu1 %vm589_vm0, %v573_v63  ;;  %v575_v5 = vmax.f32 %v525_v0, 0.0 }
 0x194   : > { %v574_v3 = vmax.f32 %v520_v2, 0.0  ;;  %v1224_v4 = vpop.f32.mrb[28].mxu0 }
 0x195   : > { %v535_v6 = vadd.f32 %v1224_v4, %v1733_v47  ;;  %v529_v7 = vpop.f32.mrb[29].mxu0 }
 0x196   : > { %v530_v8 = vadd.f32 %v1733_v47, %v529_v7  ;;  %1271 = vmatprep.mubr.msk.f32.mxu1 %vm589_vm0, %v574_v3 }
 0x197   : > { %1272 = vmatmul.mubr.msk.f32.gmra.mrb[26].mxu1 %vm589_vm0, %v575_v5  ;;  %v577_v11 = vmax.f32 %v535_v6, 0.0 }
 0x198   : > { %v576_v9 = vmax.f32 %v530_v8, 0.0  ;;  %v1227_v10 = vpop.f32.mrb[30].mxu0 }
 0x199   : > { %v545_v12 = vadd.f32 %v1227_v10, %v1733_v47  ;;  %v539_v13 = vpop.f32.mrb[31].mxu0 }
 0x19a   : > { %v540_v14 = vadd.f32 %v1733_v47, %v539_v13  ;;  %1274 = vmatprep.mubr.msk.f32.mxu1 %vm589_vm0, %v576_v9 }
 0x19b   : > { %1275 = vmatmul.mubr.msk.f32.gmra.mrb[28].mxu1 %vm589_vm0, %v577_v11  ;;  %v579_v16 = vmax.f32 %v545_v12, 0.0 }
 0x19c   : > { %v578_v15 = vmax.f32 %v540_v14, 0.0 }
 0x19e   : > { %1277 = vmatprep.mubr.msk.f32.mxu1 %vm589_vm0, %v578_v15 }
 0x19f   : > { %1278 = vmatmul.mubr.msk.f32.gmra.mrb[30].mxu1 %vm589_vm0, %v579_v16 }
 0x236   : > { %v1234_v47 = vpop.f32.mrb[0].mxu1 }
 0x237   : > { %v764_v18 = vadd.f32 %v1234_v47, %v1804_v17  ;;  %v758_v19 = vpop.f32.mrb[1].mxu1 }
 0x238   : > { %v759_v20 = vadd.f32 %v1804_v17, %v758_v19 }
 0x239   : > { %919 = vst.msk [vmem:[%s1809_s27 + $0x8] sm:$0xff] %vm917_vm2, %v764_v18 }
 0x23a   : > { %918 = vst.msk [vmem:[%s1809_s27] sm:$0xff] %vm917_vm2, %v759_v20  ;;  %v1237_v21 = vpop.f32.mrb[2].mxu1 }
 0x23b   : > { %v774_v22 = vadd.f32 %v1237_v21, %v1804_v17  ;;  %v768_v23 = vpop.f32.mrb[3].mxu1 }
 0x23c   : > { %v769_v24 = vadd.f32 %v1804_v17, %v768_v23 }
 0x23d   : > { %921 = vst.msk [vmem:[%s1809_s27 + $0x18] sm:$0xff] %vm917_vm2, %v774_v22 }
 0x23e   : > { %920 = vst.msk [vmem:[%s1809_s27 + $0x10] sm:$0xff] %vm917_vm2, %v769_v24  ;;  %v1240_v25 = vpop.f32.mrb[4].mxu1 }
 0x23f   : > { %v784_v26 = vadd.f32 %v1240_v25, %v1804_v17  ;;  %v778_v27 = vpop.f32.mrb[5].mxu1 }
 0x240   : > { %v779_v28 = vadd.f32 %v1804_v17, %v778_v27 }
 0x241   : > { %923 = vst.msk [vmem:[%s1809_s27 + $0x28] sm:$0xff] %vm917_vm2, %v784_v26 }
 0x242   : > { %922 = vst.msk [vmem:[%s1809_s27 + $0x20] sm:$0xff] %vm917_vm2, %v779_v28  ;;  %v1243_v29 = vpop.f32.mrb[6].mxu1 }
 0x243   : > { %v794_v30 = vadd.f32 %v1243_v29, %v1804_v17  ;;  %v788_v31 = vpop.f32.mrb[7].mxu1 }
 0x244   : > { %v789_v32 = vadd.f32 %v1804_v17, %v788_v31 }
 0x245   : > { %925 = vst.msk [vmem:[%s1809_s27 + $0x38] sm:$0xff] %vm917_vm2, %v794_v30 }
 0x246   : > { %924 = vst.msk [vmem:[%s1809_s27 + $0x30] sm:$0xff] %vm917_vm2, %v789_v32  ;;  %v1246_v33 = vpop.f32.mrb[8].mxu1 }
 0x247   : > { %v804_v34 = vadd.f32 %v1246_v33, %v1804_v17  ;;  %v798_v35 = vpop.f32.mrb[9].mxu1 }
 0x248   : > { %v799_v36 = vadd.f32 %v1804_v17, %v798_v35 }
 0x249   : > { %927 = vst.msk [vmem:[%s1809_s27 + $0x48] sm:$0xff] %vm917_vm2, %v804_v34 }
 0x24a   : > { %926 = vst.msk [vmem:[%s1809_s27 + $0x40] sm:$0xff] %vm917_vm2, %v799_v36  ;;  %v1249_v37 = vpop.f32.mrb[10].mxu1 }
 0x24b   : > { %v814_v38 = vadd.f32 %v1249_v37, %v1804_v17  ;;  %v808_v39 = vpop.f32.mrb[11].mxu1 }
 0x24c   : > { %v809_v40 = vadd.f32 %v1804_v17, %v808_v39 }
 0x24d   : > { %929 = vst.msk [vmem:[%s1809_s27 + $0x58] sm:$0xff] %vm917_vm2, %v814_v38 }
 0x24e   : > { %928 = vst.msk [vmem:[%s1809_s27 + $0x50] sm:$0xff] %vm917_vm2, %v809_v40  ;;  %v1252_v41 = vpop.f32.mrb[12].mxu1 }
 0x24f   : > { %v824_v42 = vadd.f32 %v1252_v41, %v1804_v17  ;;  %v818_v43 = vpop.f32.mrb[13].mxu1 }
 0x250   : > { %v819_v44 = vadd.f32 %v1804_v17, %v818_v43 }
 0x251   : > { %931 = vst.msk [vmem:[%s1809_s27 + $0x68] sm:$0xff] %vm917_vm2, %v824_v42 }
 0x252   : > { %930 = vst.msk [vmem:[%s1809_s27 + $0x60] sm:$0xff] %vm917_vm2, %v819_v44  ;;  %v1255_v45 = vpop.f32.mrb[14].mxu1 }
 0x253   : > { %v834_v46 = vadd.f32 %v1255_v45, %v1804_v17  ;;  %v828_v48 = vpop.f32.mrb[15].mxu1 }
 0x254   : > { %v829_v49 = vadd.f32 %v1804_v17, %v828_v48 }
 0x255   : > { %933 = vst.msk [vmem:[%s1809_s27 + $0x78] sm:$0xff] %vm917_vm2, %v834_v46 }
 0x256   : > { %932 = vst.msk [vmem:[%s1809_s27 + $0x70] sm:$0xff] %vm917_vm2, %v829_v49  ;;  %v1258_v50 = vpop.f32.mrb[16].mxu1 }
 0x257   : > { %v844_v51 = vadd.f32 %v1258_v50, %v1804_v17  ;;  %v838_v52 = vpop.f32.mrb[17].mxu1 }
 0x258   : > { %v839_v53 = vadd.f32 %v1804_v17, %v838_v52 }
 0x259   : > { %935 = vst.msk [vmem:[%s1809_s27 + $0x88] sm:$0xff] %vm917_vm2, %v844_v51 }
 0x25a   : > { %934 = vst.msk [vmem:[%s1809_s27 + $0x80] sm:$0xff] %vm917_vm2, %v839_v53  ;;  %v1261_v54 = vpop.f32.mrb[18].mxu1 }
 0x25b   : > { %v854_v55 = vadd.f32 %v1261_v54, %v1804_v17  ;;  %v848_v56 = vpop.f32.mrb[19].mxu1 }
 0x25c   : > { %v849_v57 = vadd.f32 %v1804_v17, %v848_v56 }
 0x25d   : > { %937 = vst.msk [vmem:[%s1809_s27 + $0x98] sm:$0xff] %vm917_vm2, %v854_v55 }
 0x25e   : > { %936 = vst.msk [vmem:[%s1809_s27 + $0x90] sm:$0xff] %vm917_vm2, %v849_v57  ;;  %v1264_v58 = vpop.f32.mrb[20].mxu1 }
 0x25f   : > { %v864_v59 = vadd.f32 %v1264_v58, %v1804_v17  ;;  %v858_v60 = vpop.f32.mrb[21].mxu1 }
 0x260   : > { %v859_v61 = vadd.f32 %v1804_v17, %v858_v60 }
 0x261   : > { %939 = vst.msk [vmem:[%s1809_s27 + $0xa8] sm:$0xff] %vm917_vm2, %v864_v59 }
 0x262   : > { %938 = vst.msk [vmem:[%s1809_s27 + $0xa0] sm:$0xff] %vm917_vm2, %v859_v61  ;;  %v1267_v62 = vpop.f32.mrb[22].mxu1 }
 0x263   : > { %v874_v63 = vadd.f32 %v1267_v62, %v1804_v17  ;;  %v868_v0 = vpop.f32.mrb[23].mxu1 }
 0x264   : > { %v869_v1 = vadd.f32 %v1804_v17, %v868_v0 }
 0x265   : > { %941 = vst.msk [vmem:[%s1809_s27 + $0xb8] sm:$0xff] %vm917_vm2, %v874_v63 }
 0x266   : > { %940 = vst.msk [vmem:[%s1809_s27 + $0xb0] sm:$0xff] %vm917_vm2, %v869_v1  ;;  %v1270_v2 = vpop.f32.mrb[24].mxu1 }
 0x267   : > { %v884_v3 = vadd.f32 %v1270_v2, %v1804_v17  ;;  %v878_v4 = vpop.f32.mrb[25].mxu1 }
 0x268   : > { %v879_v5 = vadd.f32 %v1804_v17, %v878_v4 }
 0x269   : > { %943 = vst.msk [vmem:[%s1809_s27 + $0xc8] sm:$0xff] %vm917_vm2, %v884_v3 }
 0x26a   : > { %942 = vst.msk [vmem:[%s1809_s27 + $0xc0] sm:$0xff] %vm917_vm2, %v879_v5  ;;  %v1273_v6 = vpop.f32.mrb[26].mxu1 }
 0x26b   : > { %v894_v7 = vadd.f32 %v1273_v6, %v1804_v17  ;;  %v888_v8 = vpop.f32.mrb[27].mxu1 }
 0x26c   : > { %v889_v9 = vadd.f32 %v1804_v17, %v888_v8 }
 0x26d   : > { %945 = vst.msk [vmem:[%s1809_s27 + $0xd8] sm:$0xff] %vm917_vm2, %v894_v7 }
 0x26e   : > { %944 = vst.msk [vmem:[%s1809_s27 + $0xd0] sm:$0xff] %vm917_vm2, %v889_v9  ;;  %v1276_v10 = vpop.f32.mrb[28].mxu1 }
 0x26f   : > { %v904_v11 = vadd.f32 %v1276_v10, %v1804_v17  ;;  %v898_v12 = vpop.f32.mrb[29].mxu1 }
 0x270   : > { %v899_v13 = vadd.f32 %v1804_v17, %v898_v12 }
 0x271   : > { %947 = vst.msk [vmem:[%s1809_s27 + $0xe8] sm:$0xff] %vm917_vm2, %v904_v11 }
 0x272   : > { %946 = vst.msk [vmem:[%s1809_s27 + $0xe0] sm:$0xff] %vm917_vm2, %v899_v13  ;;  %v1279_v14 = vpop.f32.mrb[30].mxu1 }
 0x273   : > { %v914_v15 = vadd.f32 %v1279_v14, %v1804_v17  ;;  %v908_v16 = vpop.f32.mrb[31].mxu1 }
 0x274   : > { %v909_v47 = vadd.f32 %v1804_v17, %v908_v16 }
 0x275   : > { %949 = vst.msk [vmem:[%s1809_s27 + $0xf8] sm:$0xff] %vm917_vm2, %v914_v15 }
 0x276   : > { %948 = vst.msk [vmem:[%s1809_s27 + $0xf0] sm:$0xff] %vm917_vm2, %v909_v47 }
 0x277 PF: > { %p16_p6 = scmp.ge.s32.totalorder %s1627_s12, 4   ;;  %s1938_s18 = smov %s1480_s19 }
 0x278   : > { %s1939_s19 = smov %s1484_s20  ;;  %s1940_s20 = smov %s1638_s17 }
 0x279   : > { %s1941_s21 = smov %s1627_s12  ;;  %18 = sbr.rel (!%p16_p6) target bundleno = 4 (0x4), region = 88 }
 0x280   :  { %972 = vsyncpa [#allocation3], 1 }
 0x281   :  { %974 = vsyncpa [#allocation3 + $0x1], 1 }
 0x282   :  { %975 = vsyncpa [#allocation5], 1 }

</bundles_post_ra>
